<compile_context>
chip_gen: v7x
topology: tpu7x:2x2x1
jax: 0.10.0
libtpu: 0.0.40
codegen_flags: <defaults>
</compile_context>

<pallas_src>
import functools

import jax
import jax.numpy as jnp
from jax.experimental import pallas as pl
from jax.experimental.pallas import tpu as pltpu


def _round_up(v, m):
    return (v + m - 1) // m * m


def _vmem_limit_bytes():
    # ~75% of physical VMEM per TensorCore: 96 MiB on v5e/v6e (128 MiB phys),
    # 48 MiB on v7x (64 MiB phys). Leaves headroom for double-buffered blocks,
    # the output block and compiler scratch.
    try:
        cap = getattr(pltpu.get_tpu_info(), "vmem_capacity_bytes", None)
        if cap:
            return int(cap) * 3 // 4
    except Exception:
        pass
    return 48 * 1024 * 1024


# ----------------------------------------------------------------------------
# Kernel: one GCNConv layer, fused feature transform + normalized aggregation.
#   out[i_tile] = act( dinv[i] * sum_k A[i,k] @ (dinv[k] * (X[k] @ W)) + b )
# Grid: (row tiles over target nodes [parallel], column tiles over A [arbitrary]).
# ----------------------------------------------------------------------------
def _gcn_layer_kernel(a_ref, dk_ref, di_ref, x_ref, w_ref, b_ref, o_ref, acc_ref,
                      *, apply_relu):
    k = pl.program_id(1)

    @pl.when(k == 0)
    def _init():
        acc_ref[...] = jnp.zeros_like(acc_ref)

    # Feature transform for this slab of source nodes (recomputed per row tile;
    # f_pad <= tile size keeps the recompute below the aggregation flops).
    xw = jnp.dot(x_ref[...], w_ref[...], preferred_element_type=jnp.float32)
    xw = (xw * dk_ref[...]).astype(jnp.bfloat16)            # right D^{-1/2}

    a = a_ref[...].astype(jnp.bfloat16)                      # int8 HBM -> bf16 (VPU cast)
    acc_ref[...] += jnp.dot(a, xw, preferred_element_type=jnp.float32)

    @pl.when(k == pl.num_programs(1) - 1)
    def _finalize():
        out = acc_ref[...] * di_ref[...] + b_ref[...]        # left D^{-1/2} + bias
        if apply_relu:
            out = jnp.maximum(out, 0.0)
        o_ref[...] = out.astype(o_ref.dtype)


def _gcn_layer(a_int8, dinv, x_bf16, w_bf16, b_f32, *, apply_relu, out_dtype,
               vmem_limit):
    n_pad = a_int8.shape[0]
    f_pad = x_bf16.shape[1]
    h_pad = w_bf16.shape[1]

    # 256-row tiles where alignment allows (v6e/v7x sweet spot), else 128 (v5e MXU).
    tm = 256 if n_pad % 256 == 0 else 128
    tk = tm
    grid = (n_pad // tm, n_pad // tk)

    flops = 2 * (grid[0] * n_pad * f_pad * h_pad + n_pad * n_pad * h_pad)
    bytes_accessed = (a_int8.size * 1
                      + grid[0] * x_bf16.size * 2
                      + w_bf16.size * 2
                      + 2 * dinv.size * 4
                      + b_f32.size * 4
                      + n_pad * h_pad * jnp.dtype(out_dtype).itemsize)
    cost = pl.CostEstimate(flops=int(flops), transcendentals=0,
                           bytes_accessed=int(bytes_accessed))

    kernel = functools.partial(_gcn_layer_kernel, apply_relu=apply_relu)

    return pl.pallas_call(
        kernel,
        out_shape=jax.ShapeDtypeStruct((n_pad, h_pad), out_dtype),
        grid_spec=pltpu.PrefetchScalarGridSpec(
            num_scalar_prefetch=0,
            grid=grid,
            in_specs=[
                pl.BlockSpec((tm, tk), lambda i, k: (i, k)),        # A+I tile (int8)
                pl.BlockSpec((tk, 1), lambda i, k: (k, 0)),         # D^{-1/2} (source nodes)
                pl.BlockSpec((tm, 1), lambda i, k: (i, 0)),         # D^{-1/2} (target nodes)
                pl.BlockSpec((tk, f_pad), lambda i, k: (k, 0)),     # X slab (bf16)
                pl.BlockSpec((f_pad, h_pad), lambda i, k: (0, 0)),  # W (bf16, lane-padded)
                pl.BlockSpec((1, h_pad), lambda i, k: (0, 0)),      # bias (lane-padded)
            ],
            out_specs=pl.BlockSpec((tm, h_pad), lambda i, k: (i, 0)),
            scratch_shapes=[pltpu.VMEM((tm, h_pad), jnp.float32)],
        ),
        compiler_params=pltpu.CompilerParams(
            dimension_semantics=("parallel", "arbitrary"),
            vmem_limit_bytes=vmem_limit,
        ),
        cost_estimate=cost,
    )(a_int8, dinv, dinv, x_bf16, w_bf16, b_f32)


# ----------------------------------------------------------------------------
# Graph preprocessing (hoist out of the per-call path for static graphs).
# ----------------------------------------------------------------------------
def preprocess_graph(edge_index, num_nodes):
    """Build (A+I) as int8 and D^{-1/2}, padded to a 128-aligned node count."""
    n_pad = _round_up(max(num_nodes, 1), 128)
    src = edge_index[0]
    dst = edge_index[1]
    off_diag = src != dst

    # PyG convention A[target, source] = 1; duplicate edges sum (scatter-add).
    # Diagonal is then SET to 1: matches add_remaining_self_loops (pre-existing
    # self loops keep weight 1, they are not doubled).
    a = jnp.zeros((n_pad, n_pad), jnp.int32).at[dst, src].add(off_diag.astype(jnp.int32))
    diag = jnp.arange(num_nodes)
    a = a.at[diag, diag].set(1)
    a_int8 = a.astype(jnp.int8)

    # Degrees via segment-sum over the edge list (no dense-matrix reduction),
    # +1 for the self loop on every real node; padded nodes get deg 0 -> dinv 0.
    deg = jax.ops.segment_sum(off_diag.astype(jnp.float32), dst,
                              num_segments=num_nodes) + 1.0
    deg = jnp.zeros((n_pad,), jnp.float32).at[:num_nodes].set(deg)
    dinv = jnp.where(deg > 0, jax.lax.rsqrt(deg), 0.0).reshape(n_pad, 1)
    return a_int8, dinv


# ----------------------------------------------------------------------------
# Forward pass.
# ----------------------------------------------------------------------------
def gcn_forward_precomputed(a_int8, dinv, x, w1, b1, w2, b2, num_nodes):
    n_pad = a_int8.shape[0]
    f = x.shape[1]
    hdim = w1.shape[1]
    c = w2.shape[1]

    f_pad = _round_up(f, 128)
    h_pad = _round_up(hdim, 128)
    c_pad = _round_up(c, 128)
    vmem_limit = _vmem_limit_bytes()

    # Lane/sublane-dense, zero-padded operands (bf16 MXU feeds, f32 accumulate).
    x_p = jnp.zeros((n_pad, f_pad), jnp.bfloat16).at[:num_nodes, :f].set(
        x.astype(jnp.bfloat16))
    w1_p = jnp.zeros((f_pad, h_pad), jnp.bfloat16).at[:f, :hdim].set(
        w1.astype(jnp.bfloat16))
    b1_p = jnp.zeros((1, h_pad), jnp.float32).at[:, :hdim].set(
        b1.reshape(1, hdim).astype(jnp.float32))
    w2_p = jnp.zeros((h_pad, c_pad), jnp.bfloat16).at[:hdim, :c].set(
        w2.astype(jnp.bfloat16))
    b2_p = jnp.zeros((1, c_pad), jnp.float32).at[:, :c].set(
        b2.reshape(1, c).astype(jnp.float32))

    # Layer 1: H = relu(D^{-1/2}(A+I)D^{-1/2} X W1 + b1); H lives in HBM as bf16.
    h = _gcn_layer(a_int8, dinv, x_p, w1_p, b1_p,
                   apply_relu=True, out_dtype=jnp.bfloat16, vmem_limit=vmem_limit)

    # F.dropout(p=0.5, training=self.training): module in eval mode -> identity.
    # TODO(synk): training-mode dropout would need pltpu.prng_seed/prng_random_bits
    # and cannot bit-match torch's RNG stream.

    # Layer 2: out = D^{-1/2}(A+I)D^{-1/2} H W2 + b2
    out = _gcn_layer(a_int8, dinv, h, w2_p, b2_p,
                     apply_relu=False, out_dtype=jnp.float32, vmem_limit=vmem_limit)
    return out[:num_nodes, :c]


def gcn_forward(x, edge_index, w1, b1, w2, b2):
    """Convenience wrapper matching GCN.forward(x, edge_index).

    For static graphs call preprocess_graph once and reuse it via
    gcn_forward_precomputed — the dense scatter / degree build dominates at scale.
    """
    n = x.shape[0]
    a_int8, dinv = preprocess_graph(edge_index, n)
    return gcn_forward_precomputed(a_int8, dinv, x, w1, b1, w2, b2, n)


def _glorot(key, shape):
    fan_in, fan_out = shape
    limit = jnp.sqrt(6.0 / (fan_in + fan_out))
    return jax.random.uniform(key, shape, jnp.float32, -limit, limit)


if __name__ == "__main__":
    num_nodes = 8
    num_feats = 16
    hidden_channels = 64
    num_classes = 4

    key = jax.random.PRNGKey(0)
    kx, kw1, kw2 = jax.random.split(key, 3)

    # Node features
    x = jax.random.normal(kx, (num_nodes, num_feats), jnp.float32)

    # Small undirected ring graph (both directions), shape (2, E)
    src = jnp.arange(num_nodes, dtype=jnp.int32)
    dst = (src + 1) % num_nodes
    edge_index = jnp.concatenate(
        [jnp.stack([src, dst]), jnp.stack([dst, src])], axis=1
    )  # (2, 16)

    # Deterministic parameter init (GCNConv: glorot weights, zero bias)
    w1 = _glorot(kw1, (num_feats, hidden_channels))
    b1 = jnp.zeros((hidden_channels,), jnp.float32)
    w2 = _glorot(kw2, (hidden_channels, num_classes))
    b2 = jnp.zeros((num_classes,), jnp.float32)

    # Static graph: preprocess once (hoisted out of the forward hot path).
    a_int8, dinv = preprocess_graph(edge_index, num_nodes)
    out = gcn_forward_precomputed(a_int8, dinv, x, w1, b1, w2, b2, num_nodes)
    jax.block_until_ready(out)
    assert out.shape == (num_nodes, num_classes)
    print("KERNEL_OK")
</pallas_src>

<mosaic_0001>
module attributes {stable_mosaic.version = 11 : i64} {
  func.func @_gcn_layer_kernel(%arg0: i32, %arg1: i32, %arg2: memref<128x128xi8, #tpu.memory_space<vmem>>, %arg3: memref<128x1xf32, #tpu.memory_space<vmem>>, %arg4: memref<128x1xf32, #tpu.memory_space<vmem>>, %arg5: memref<128x128xbf16, #tpu.memory_space<vmem>>, %arg6: memref<128x128xbf16, #tpu.memory_space<vmem>>, %arg7: memref<1x128xf32, #tpu.memory_space<vmem>>, %arg8: memref<128x128xbf16, #tpu.memory_space<vmem>>, %arg9: memref<128x128xf32, #tpu.memory_space<vmem>>) attributes {dimension_semantics = [#tpu.dimension_semantics<parallel>, #tpu.dimension_semantics<arbitrary>], iteration_bounds = array<i64: 1, 1>, scalar_prefetch = 0 : i64, scratch_operands = 1 : i64, tpu.core_type = #tpu.core_type<tc>, window_params = [{transform_indices = @transform_0, window_bounds = array<i64: 128, 128>}, {transform_indices = @transform_1, window_bounds = array<i64: 128, 1>}, {transform_indices = @transform_2, window_bounds = array<i64: 128, 1>}, {transform_indices = @transform_3, window_bounds = array<i64: 128, 128>}, {pipeline_mode = #tpu.pipeline_mode<synchronous>, transform_indices = @transform_4, window_bounds = array<i64: 128, 128>}, {pipeline_mode = #tpu.pipeline_mode<synchronous>, transform_indices = @transform_5, window_bounds = array<i64: 1, 128>}, {transform_indices = @transform_6, window_bounds = array<i64: 128, 128>}]} {
    %c0_i32 = arith.constant 0 : i32
    %0 = arith.cmpi eq, %arg1, %c0_i32 : i32
    %1 = arith.extui %0 : i1 to i32
    %c0_i32_0 = arith.constant 0 : i32
    %2 = arith.cmpi ne, %1, %c0_i32_0 : i32
    scf.if %2 {
      %cst_15 = arith.constant 0.000000e+00 : f32
      %19 = vector.broadcast %cst_15 : f32 to vector<128x128xf32>
      %c0_16 = arith.constant 0 : index
      %c0_17 = arith.constant 0 : index
      %20 = vector.load %arg9[%c0_16, %c0_17] : memref<128x128xf32, #tpu.memory_space<vmem>>, vector<128x128xf32>
      tpu.vector_store %arg9[%c0_16, %c0_17], %19 {strides = array<i32>} : memref<128x128xf32, #tpu.memory_space<vmem>>, vector<128x128xf32>,
    } else {
    }
    %c0 = arith.constant 0 : index
    %c0_1 = arith.constant 0 : index
    %3 = vector.load %arg5[%c0, %c0_1] : memref<128x128xbf16, #tpu.memory_space<vmem>>, vector<128x128xbf16>
    %c0_2 = arith.constant 0 : index
    %c0_3 = arith.constant 0 : index
    %4 = vector.load %arg6[%c0_2, %c0_3] : memref<128x128xbf16, #tpu.memory_space<vmem>>, vector<128x128xbf16>
    %cst = arith.constant dense<0.000000e+00> : vector<128x128xf32>
    %5 = tpu.matmul %3, %4, %cst {dimension_numbers = #tpu.dot_dimension_numbers<[1], [0], [0], [1], [0, 0, 1, 1], [], []>} : vector<128x128xbf16>, vector<128x128xbf16>, vector<128x128xf32> -> vector<128x128xf32>
    %c0_4 = arith.constant 0 : index
    %c0_5 = arith.constant 0 : index
    %6 = vector.load %arg3[%c0_4, %c0_5] : memref<128x1xf32, #tpu.memory_space<vmem>>, vector<128x1xf32>
    %7 = vector.broadcast %6 : vector<128x1xf32> to vector<128x128xf32>
    %8 = arith.mulf %5, %7 : vector<128x128xf32>
    %9 = arith.truncf %8 : vector<128x128xf32> to vector<128x128xbf16>
    %c0_6 = arith.constant 0 : index
    %c0_7 = arith.constant 0 : index
    %10 = vector.load %arg2[%c0_6, %c0_7] : memref<128x128xi8, #tpu.memory_space<vmem>>, vector<128x128xi8>
    %11 = arith.sitofp %10 : vector<128x128xi8> to vector<128x128xbf16>
    %c0_8 = arith.constant 0 : index
    %c0_9 = arith.constant 0 : index
    %12 = vector.load %arg9[%c0_8, %c0_9] : memref<128x128xf32, #tpu.memory_space<vmem>>, vector<128x128xf32>
    %cst_10 = arith.constant dense<0.000000e+00> : vector<128x128xf32>
    %13 = tpu.matmul %11, %9, %cst_10 {dimension_numbers = #tpu.dot_dimension_numbers<[1], [0], [0], [1], [0, 0, 1, 1], [], []>} : vector<128x128xbf16>, vector<128x128xbf16>, vector<128x128xf32> -> vector<128x128xf32>
    %14 = arith.addf %12, %13 : vector<128x128xf32>
    %c0_11 = arith.constant 0 : index
    %c0_12 = arith.constant 0 : index
    %15 = vector.load %arg9[%c0_11, %c0_12] : memref<128x128xf32, #tpu.memory_space<vmem>>, vector<128x128xf32>
    tpu.vector_store %arg9[%c0_11, %c0_12], %14 {strides = array<i32>} : memref<128x128xf32, #tpu.memory_space<vmem>>, vector<128x128xf32>,
    %c0_i32_13 = arith.constant 0 : i32
    %16 = arith.cmpi eq, %arg1, %c0_i32_13 : i32
    %17 = arith.extui %16 : i1 to i32
    %c0_i32_14 = arith.constant 0 : i32
    %18 = arith.cmpi ne, %17, %c0_i32_14 : i32
    scf.if %18 {
      %c0_15 = arith.constant 0 : index
      %c0_16 = arith.constant 0 : index
      %19 = vector.load %arg9[%c0_15, %c0_16] : memref<128x128xf32, #tpu.memory_space<vmem>>, vector<128x128xf32>
      %c0_17 = arith.constant 0 : index
      %c0_18 = arith.constant 0 : index
      %20 = vector.load %arg4[%c0_17, %c0_18] : memref<128x1xf32, #tpu.memory_space<vmem>>, vector<128x1xf32>
      %21 = vector.broadcast %20 : vector<128x1xf32> to vector<128x128xf32>
      %22 = arith.mulf %19, %21 : vector<128x128xf32>
      %c0_19 = arith.constant 0 : index
      %c0_20 = arith.constant 0 : index
      %23 = vector.load %arg7[%c0_19, %c0_20] : memref<1x128xf32, #tpu.memory_space<vmem>>, vector<1x128xf32>
      %24 = vector.broadcast %23 : vector<1x128xf32> to vector<128x128xf32>
      %25 = arith.addf %22, %24 : vector<128x128xf32>
      %cst_21 = arith.constant 0.000000e+00 : f32
      %26 = vector.broadcast %cst_21 : f32 to vector<128x128xf32>
      %27 = arith.maximumf %25, %26 : vector<128x128xf32>
      %28 = arith.truncf %27 : vector<128x128xf32> to vector<128x128xbf16>
      %c0_22 = arith.constant 0 : index
      %c0_23 = arith.constant 0 : index
      %29 = vector.load %arg8[%c0_22, %c0_23] : memref<128x128xbf16, #tpu.memory_space<vmem>>, vector<128x128xbf16>
      tpu.vector_store %arg8[%c0_22, %c0_23], %28 {strides = array<i32>} : memref<128x128xbf16, #tpu.memory_space<vmem>>, vector<128x128xbf16>,
    } else {
    }
    return
  }
  func.func @transform_0(%arg0: i32, %arg1: i32) -> (i32, i32) {
    %c0_i32 = arith.constant 0 : i32
    return %arg0, %arg1 : i32, i32
  }
  func.func @transform_1(%arg0: i32, %arg1: i32) -> (i32, i32) {
    %c0_i32 = arith.constant 0 : i32
    %c0_i32_0 = arith.constant 0 : i32
    return %arg1, %c0_i32 : i32, i32
  }
  func.func @transform_2(%arg0: i32, %arg1: i32) -> (i32, i32) {
    %c0_i32 = arith.constant 0 : i32
    %c0_i32_0 = arith.constant 0 : i32
    return %arg0, %c0_i32 : i32, i32
  }
  func.func @transform_3(%arg0: i32, %arg1: i32) -> (i32, i32) {
    %c0_i32 = arith.constant 0 : i32
    %c0_i32_0 = arith.constant 0 : i32
    return %arg1, %c0_i32 : i32, i32
  }
  func.func @transform_4(%arg0: i32, %arg1: i32) -> (i32, i32) {
    %c0_i32 = arith.constant 0 : i32
    %c0_i32_0 = arith.constant 0 : i32
    %c0_i32_1 = arith.constant 0 : i32
    return %c0_i32, %c0_i32_0 : i32, i32
  }
  func.func @transform_5(%arg0: i32, %arg1: i32) -> (i32, i32) {
    %c0_i32 = arith.constant 0 : i32
    %c0_i32_0 = arith.constant 0 : i32
    %c0_i32_1 = arith.constant 0 : i32
    return %c0_i32, %c0_i32_0 : i32, i32
  }
  func.func @transform_6(%arg0: i32, %arg1: i32) -> (i32, i32) {
    %c0_i32 = arith.constant 0 : i32
    %c0_i32_0 = arith.constant 0 : i32
    return %arg0, %c0_i32 : i32, i32
  }
}

</mosaic_0001>

<bundles_post_ra>
// kernel: tpu_custom_call.1
= control target key start
LH: loop header
LB: loop body
LE: loop exit
PB: predicated region body
PF: predicated region fallthrough
CT: control target
= control target key end

     0   :  { %v1051_v2 = vmov 0   ;;  %s1283_s0 = inlined_call_operand.vmem [shape: s8[128,128], index: 0, kind: input, shape index: {}]   ;;  %s1284_s1 = inlined_call_operand.vmem [shape: f32[128,1], index: 1, kind: input, shape index: {}]   ;;  %s1285_s2 = inlined_call_operand.vmem [shape: f32[128,1], index: 2, kind: input, shape index: {}]   ;;  %s1286_s3 = inlined_call_operand.vmem [shape: bf16[128,128], index: 3, kind: input, shape index: {}]   ;;  %s1287_s4 = inlined_call_operand.vmem [shape: bf16[128,128], index: 4, kind: input, shape index: {}]   ;;  %s1288_s5 = inlined_call_operand.vmem [shape: f32[1,128], index: 5, kind: input, shape index: {}]   ;;  %s1289_s6 = inlined_call_operand.hbm [shape: bf16[128,128], index: 6, kind: output, shape index: {}]  }
   0x1   :  { %v1011_v0 = vld [vmem:[%s1287_s4] sm:$0xff]   ;;  %v1012_v1 = vld [vmem:[%s1287_s4 + $0x8] sm:$0xff]   ;;  %1009 = vset.pattern.permute.xlu0 %v1051_v2  ;;  %1010 = vset.pattern.permute.xlu1 %v1051_v2  ;;  %v1013_v3 = vld [vmem:[%s1287_s4 + $0x10] sm:$0xff]  }
   0x2   :  { %941 = vmatprep.subr.bf16.mxu0 %v1011_v0  ;;  %v1014_v4 = vld [vmem:[%s1287_s4 + $0x18] sm:$0xff]   ;;  %v1019_v5 = vld [vmem:[%s1286_s3] sm:$0xff]   ;;  %v1016_v8 = vld [vmem:[%s1287_s4 + $0x28] sm:$0xff]  }
   0x3   :  { %942 = vmatpush3.bf16.msra.mxu0 %v1011_v0  ;;  %957 = vmatprep.mubr.bf16.mxu0 %v1019_v5  ;;  %v1015_v6 = vld [vmem:[%s1287_s4 + $0x20] sm:$0xff]   ;;  %v272_v9 = vld [vmem:[%s1284_s1 + $0x10] sm:$0xff]  ;;  %v271_v10 = vld [vmem:[%s1284_s1 + $0x8] sm:$0xff] }
   0x4   :  { %943 = vmatprep.subr.bf16.mxu0 %v1012_v1  ;;  %v270_v7 = vld [vmem:[%s1284_s1] sm:$0xff]  ;;  %298 = vperm.xlu1 %1010, %v272_v9   ;;  %v273_v11 = vld [vmem:[%s1284_s1 + $0x18] sm:$0xff]  ;;  %v1017_v12 = vld [vmem:[%s1287_s4 + $0x30] sm:$0xff]  }
   0x5   :  { %288 = vperm.xlu0 %1009, %v270_v7   ;;  %v274_v13 = vld [vmem:[%s1284_s1 + $0x20] sm:$0xff]  ;;  %v275_v14 = vld [vmem:[%s1284_s1 + $0x28] sm:$0xff]  ;;  %v1018_v15 = vld [vmem:[%s1287_s4 + $0x38] sm:$0xff]  }
   0x6   :  { %v276_v16 = vld [vmem:[%s1284_s1 + $0x30] sm:$0xff]  ;;  %v277_v17 = vld [vmem:[%s1284_s1 + $0x38] sm:$0xff] }
   0x7   :  { %944 = vmatpush3.bf16.msra.mxu0 %v1012_v1 }
   0x8   :  { %945 = vmatprep.subr.bf16.mxu0 %v1013_v3  ;;  %303 = vperm.xlu1 %1010, %v273_v11  }
   0x9   :  { %293 = vperm.xlu0 %1009, %v271_v10  }
   0xb   :  { %946 = vmatpush3.bf16.msra.mxu0 %v1013_v3 }
   0xc   :  { %947 = vmatprep.subr.bf16.mxu0 %v1014_v4  ;;  %313 = vperm.xlu1 %1010, %v275_v14  }
   0xd   :  { %308 = vperm.xlu0 %1009, %v274_v13  }
   0xf   :  { %948 = vmatpush3.bf16.msra.mxu0 %v1014_v4 }
  0x10   :  { %949 = vmatprep.subr.bf16.mxu0 %v1015_v6 }
  0x13   :  { %950 = vmatpush3.bf16.msra.mxu0 %v1015_v6 }
  0x14   :  { %951 = vmatprep.subr.bf16.mxu0 %v1016_v8 }
  0x17   :  { %952 = vmatpush3.bf16.msra.mxu0 %v1016_v8 }
  0x18   :  { %953 = vmatprep.subr.bf16.mxu0 %v1017_v12 }
  0x19   :  { %11 = vsyncpa [#allocation4], 0  ;;  %318 = vperm.xlu0 %1009, %v276_v16   ;;  %v278_v18 = vld [vmem:[%s1284_s1 + $0x40] sm:$0xff]  ;;  %323 = vperm.xlu1 %1010, %v277_v17   ;;  %v1020_v19 = vld [vmem:[%s1286_s3 + $0x8] sm:$0xff]  }
  0x1a   :  { %v279_v20 = vld [vmem:[%s1284_s1 + $0x48] sm:$0xff]  ;;  %v1021_v21 = vld [vmem:[%s1286_s3 + $0x10] sm:$0xff]   ;;  %v281_v23 = vld [vmem:[%s1284_s1 + $0x58] sm:$0xff] }
  0x1b   :  { %954 = vmatpush3.bf16.msra.mxu0 %v1017_v12  ;;  %v280_v22 = vld [vmem:[%s1284_s1 + $0x50] sm:$0xff]  ;;  %v282_v24 = vld [vmem:[%s1284_s1 + $0x60] sm:$0xff]  ;;  %v1022_v25 = vld [vmem:[%s1286_s3 + $0x18] sm:$0xff]  }
  0x1c   :  { %955 = vmatprep.subr.bf16.mxu0 %v1018_v15  ;;  %v283_v26 = vld [vmem:[%s1284_s1 + $0x68] sm:$0xff]  ;;  %v1023_v27 = vld [vmem:[%s1286_s3 + $0x20] sm:$0xff]   ;;  %v284_v28 = vld [vmem:[%s1284_s1 + $0x70] sm:$0xff] }
  0x1d   :  { %328 = vperm.xlu0 %1009, %v278_v18   ;;  %333 = vperm.xlu1 %1010, %v279_v20   ;;  %v285_v29 = vld [vmem:[%s1284_s1 + $0x78] sm:$0xff]  ;;  %v566_v30 = vld [vmem:[%s1285_s2] sm:$0xff]  ;;  %v1024_v31 = vld [vmem:[%s1286_s3 + $0x28] sm:$0xff]  }
  0x1e   :  { %v567_v32 = vld [vmem:[%s1285_s2 + $0x8] sm:$0xff]  ;;  %v1025_v33 = vld [vmem:[%s1286_s3 + $0x30] sm:$0xff]   ;;  %v569_v35 = vld [vmem:[%s1285_s2 + $0x18] sm:$0xff] }
  0x1f   :  { %956 = vmatpush3.bf16.msra.mxu0 %v1018_v15  ;;  %v568_v34 = vld [vmem:[%s1285_s2 + $0x10] sm:$0xff]  ;;  %v570_v36 = vld [vmem:[%s1285_s2 + $0x20] sm:$0xff]  ;;  %v1026_v37 = vld [vmem:[%s1286_s3 + $0x38] sm:$0xff]  }
  0x20   :  { %v571_v38 = vld [vmem:[%s1285_s2 + $0x28] sm:$0xff]  ;;  %v572_v39 = vld [vmem:[%s1285_s2 + $0x30] sm:$0xff]  ;;  %v573_v40 = vld [vmem:[%s1285_s2 + $0x38] sm:$0xff] }
  0x21   :  { %338 = vperm.xlu0 %1009, %v280_v22   ;;  %343 = vperm.xlu1 %1010, %v281_v23   ;;  %v574_v41 = vld [vmem:[%s1285_s2 + $0x40] sm:$0xff]  ;;  %v575_v42 = vld [vmem:[%s1285_s2 + $0x48] sm:$0xff]  ;;  %v576_v43 = vld [vmem:[%s1285_s2 + $0x50] sm:$0xff] }
  0x22   :  { %958 = vmatmul.mubr.bf16.vlgmr.msra.gmra.mrb[0].mxu0 %v1020_v19  ;;  %v577_v44 = vld [vmem:[%s1285_s2 + $0x58] sm:$0xff]  ;;  %v578_v45 = vld [vmem:[%s1285_s2 + $0x60] sm:$0xff]  ;;  %v579_v46 = vld [vmem:[%s1285_s2 + $0x68] sm:$0xff] }
  0x23   :  { %961 = vmatprep.mubr.bf16.mxu0 %v1021_v21  ;;  %v580_v47 = vld [vmem:[%s1285_s2 + $0x70] sm:$0xff]  ;;  %v581_v48 = vld [vmem:[%s1285_s2 + $0x78] sm:$0xff]  ;;  %v1237_v49 = vld [vmem:[%s1283_s0] sm:$0xff] }
  0x24   :  { %v394_v50 = vunpack.c.l.s8.bf16 %v1237_v49 }
  0x25   :  { %348 = vperm.xlu0 %1009, %v282_v24   ;;  %353 = vperm.xlu1 %1010, %v283_v26  }
  0x26   :  { %989 = vmatprep.mubr.bf16.mxu1 %v394_v50  ;;  %v393_v50 = vld [vmem:[%s1283_s0 + $0x18] sm:$0xff] }
  0x29   :  { %358 = vperm.xlu0 %1009, %v284_v28   ;;  %363 = vperm.xlu1 %1010, %v285_v29  }
  0x2a   :  { %962 = vmatmul.mubr.bf16.gmra.mrb[4].mxu0 %v1022_v25 }
  0x2b   :  { %965 = vmatprep.mubr.bf16.mxu0 %v1023_v27 }
  0x2d   :  { %584 = vperm.xlu0 %1009, %v566_v30   ;;  %589 = vperm.xlu1 %1010, %v567_v32  }
  0x31   :  { %594 = vperm.xlu0 %1009, %v568_v34   ;;  %599 = vperm.xlu1 %1010, %v569_v35  }
  0x32   :  { %966 = vmatmul.mubr.bf16.gmra.mrb[8].mxu0 %v1024_v31 }
  0x33   :  { %969 = vmatprep.mubr.bf16.mxu0 %v1025_v33 }
  0x35   :  { %604 = vperm.xlu0 %1009, %v570_v36   ;;  %609 = vperm.xlu1 %1010, %v571_v38  }
  0x39   :  { %614 = vperm.xlu0 %1009, %v572_v39   ;;  %619 = vperm.xlu1 %1010, %v573_v40  }
  0x3a   :  { %970 = vmatmul.mubr.bf16.gmra.mrb[12].mxu0 %v1026_v37 }
  0x3d   :  { %624 = vperm.xlu0 %1009, %v574_v41   ;;  %629 = vperm.xlu1 %1010, %v575_v42  }
  0x41   :  { %634 = vperm.xlu0 %1009, %v576_v43   ;;  %639 = vperm.xlu1 %1010, %v577_v44   ;;  %v391_v43 = vld [vmem:[%s1283_s0 + $0x8] sm:$0xff]  ;;  %v395_v44 = vunpack.c.h.s8.bf16 %v1237_v49  ;;  %v401_v49 = vunpack.c.h.s8.bf16 %v393_v50 }
  0x45   :  { %644 = vperm.xlu0 %1009, %v578_v45   ;;  %649 = vperm.xlu1 %1010, %v579_v46   ;;  %v396_v45 = vunpack.c.l.s8.bf16 %v391_v43  ;;  %v392_v46 = vld [vmem:[%s1283_s0 + $0x10] sm:$0xff]  ;;  %s1052_s0 = smov [#allocation3]  }
  0x49   :  { %654 = vperm.xlu0 %1009, %v580_v47   ;;  %659 = vperm.xlu1 %1010, %v581_v48   ;;  %v397_v47 = vunpack.c.h.s8.bf16 %v391_v43  ;;  %v398_v48 = vunpack.c.l.s8.bf16 %v392_v46 }
  0x83   :  { %v299_v52 = vpop.permute.xlu1 %298 }
  0x84   :  { %v289_v51 = vpop.permute.xlu0 %288 }
  0x87   :  { %v304_v54 = vpop.permute.xlu1 %303 }
  0x88   :  { %v294_v53 = vpop.permute.xlu0 %293 }
  0x8b   :  { %v314_v56 = vpop.permute.xlu1 %313 }
  0x8c   :  { %v309_v55 = vpop.permute.xlu0 %308 }
  0x98   :  { %v319_v58 = vpop.permute.xlu0 %318  ;;  %v324_v60 = vpop.permute.xlu1 %323 }
  0x9c   :  { %v329_v5 = vpop.permute.xlu0 %328  ;;  %v334_v6 = vpop.permute.xlu1 %333 }
  0xa0   :  { %v339_v15 = vpop.permute.xlu0 %338  ;;  %v344_v17 = vpop.permute.xlu1 %343 }
  0xa4   :  { %v349_v22 = vpop.permute.xlu0 %348  ;;  %v354_v26 = vpop.permute.xlu1 %353 }
  0xa8   :  { %v359_v32 = vpop.permute.xlu0 %358  ;;  %v364_v34 = vpop.permute.xlu1 %363 }
  0xf5   :  { %v959_v57 = vpop.f32.mrb[0].mxu0 }
  0xf6   :  { %v207_v59 = vpop.f32.mrb[1].mxu0  ;;  %v368_v62 = vmul.f32 %v959_v57, %v299_v52  ;;  %v400_v52 = vunpack.c.l.s8.bf16 %v393_v50 }
  0xf7   :  { %v960_v61 = vpop.f32.mrb[2].mxu0  ;;  %v366_v1 = vmul.f32 %v289_v51, %v207_v59  ;;  %v399_v51 = vunpack.c.h.s8.bf16 %v392_v46 }
  0xf8   :  { %v369_v63 = vmul.f32 %v960_v61, %v304_v54  ;;  %v210_v0 = vpop.f32.mrb[3].mxu0  ;;  %v590_v54 = vpop.permute.xlu1 %589  ;;  %v1253_v61 = vld [vmem:[%s1288_s5] ss:$0 sm:$0xff]  ;;  %s802_s5 = sshll.u32 %s1052_s0, 4  ;;  %s803_s5 = int_to_ptr.vmem [resolvable:$true] %s802_s5 }
  0xf9   :  { %v367_v2 = vmul.f32 %v294_v53, %v210_v0  ;;  %v585_v53 = vpop.permute.xlu0 %584  ;;  %s1027_s24 = scalar_lea.vmem %s803_s5, 1024  ;;  %p1032_p1 = scmp.lt.s32.totalorder %s803_s5, %s803_s5 }
  0xfa   :  { %v383_v3 = vpack.c.bf16 %v369_v63, %v368_v62  ;;  %p1028_p0 = scmp.ne.s32.totalorder %s803_s5, %s1027_s24  ;;  %p1033_p2 = scmp.lt.s32.totalorder %s1027_s24, %s1027_s24 }
  0xfb   :  { %v382_v4 = vpack.c.bf16 %v367_v2, %v366_v1 }
  0xfc   :  { %p1034_p3 = por %p1033_p2, %p1032_p1 }
  0xfd   :  { %v963_v7 = vpop.f32.mrb[4].mxu0  ;;  %973 = vmatprep.subr.bf16.mxu1 %v382_v4 }
  0xfe   :  { %v223_v8 = vpop.f32.mrb[5].mxu0  ;;  %974 = vmatpush3.bf16.msra.mxu1 %v382_v4  ;;  %v372_v10 = vmul.f32 %v963_v7, %v319_v58  ;;  %p1035_p4 = pnand %p1034_p3, %p1028_p0 }
  0xff   :  { %v964_v9 = vpop.f32.mrb[6].mxu0  ;;  %975 = vmatprep.subr.bf16.mxu1 %v383_v3  ;;  %v370_v13 = vmul.f32 %v309_v55, %v223_v8  ;;  %v595_v55 = vpop.permute.xlu0 %594 }
 0x100   :  { %v373_v11 = vmul.f32 %v964_v9, %v324_v60  ;;  %v226_v12 = vpop.f32.mrb[7].mxu0 }
 0x101   :  { %v371_v14 = vmul.f32 %v314_v56, %v226_v12  ;;  %v600_v56 = vpop.permute.xlu1 %599 }
 0x102   :  { %v385_v16 = vpack.c.bf16 %v373_v11, %v372_v10  ;;  %976 = vmatpush3.bf16.msra.mxu1 %v383_v3 }
 0x103   :  { %v384_v18 = vpack.c.bf16 %v371_v14, %v370_v13  ;;  %v605_v57 = vpop.permute.xlu0 %604 }
 0x105   :  { %v967_v19 = vpop.f32.mrb[8].mxu0  ;;  %977 = vmatprep.subr.bf16.mxu1 %v384_v18  ;;  %v610_v58 = vpop.permute.xlu1 %609 }
 0x106   :  { %v239_v20 = vpop.f32.mrb[9].mxu0  ;;  %978 = vmatpush3.bf16.msra.mxu1 %v384_v18  ;;  %v376_v23 = vmul.f32 %v967_v19, %v339_v15 }
 0x107   :  { %v968_v21 = vpop.f32.mrb[10].mxu0  ;;  %979 = vmatprep.subr.bf16.mxu1 %v385_v16  ;;  %v374_v27 = vmul.f32 %v329_v5, %v239_v20  ;;  %v615_v59 = vpop.permute.xlu0 %614 }
 0x108   :  { %v377_v24 = vmul.f32 %v968_v21, %v344_v17  ;;  %v242_v25 = vpop.f32.mrb[11].mxu0 }
 0x109   :  { %v375_v28 = vmul.f32 %v334_v6, %v242_v25  ;;  %v620_v0 = vpop.permute.xlu1 %619 }
 0x10a   :  { %v387_v29 = vpack.c.bf16 %v377_v24, %v376_v23  ;;  %980 = vmatpush3.bf16.msra.mxu1 %v385_v16 }
 0x10b   :  { %v386_v30 = vpack.c.bf16 %v375_v28, %v374_v27  ;;  %v625_v9 = vpop.permute.xlu0 %624 }
 0x10d   :  { %v971_v31 = vpop.f32.mrb[12].mxu0  ;;  %981 = vmatprep.subr.bf16.mxu1 %v386_v30  ;;  %v630_v13 = vpop.permute.xlu1 %629 }
 0x10e   :  { %v255_v33 = vpop.f32.mrb[13].mxu0  ;;  %982 = vmatpush3.bf16.msra.mxu1 %v386_v30  ;;  %v380_v36 = vmul.f32 %v971_v31, %v359_v32 }
 0x10f   :  { %v972_v35 = vpop.f32.mrb[14].mxu0  ;;  %983 = vmatprep.subr.bf16.mxu1 %v387_v29  ;;  %v378_v39 = vmul.f32 %v349_v22, %v255_v33 }
 0x110   :  { %v381_v37 = vmul.f32 %v972_v35, %v364_v34  ;;  %v258_v38 = vpop.f32.mrb[15].mxu0 }
 0x111   :  { %v379_v40 = vmul.f32 %v354_v26, %v258_v38  ;;  %v635_v26 = vpop.permute.xlu0 %634  ;;  %v640_v30 = vpop.permute.xlu1 %639 }
 0x112   :  { %v389_v41 = vpack.c.bf16 %v381_v37, %v380_v36  ;;  %984 = vmatpush3.bf16.msra.mxu1 %v387_v29 }
 0x113   :  { %v388_v42 = vpack.c.bf16 %v379_v40, %v378_v39 }
 0x115   :  { %985 = vmatprep.subr.bf16.mxu1 %v388_v42  ;;  %v645_v40 = vpop.permute.xlu0 %644 }
 0x116   :  { %986 = vmatpush3.bf16.msra.mxu1 %v388_v42 }
 0x117   :  { %987 = vmatprep.subr.bf16.mxu1 %v389_v41 }
 0x11a   :  { %988 = vmatpush3.bf16.msra.mxu1 %v389_v41 }
 0x11d   :  { %990 = vmatmul.mubr.bf16.vlgmr.msra.gmra.mrb[0].mxu1 %v395_v44 }
 0x11e   :  { %993 = vmatprep.mubr.bf16.mxu1 %v396_v45 }
 0x125   :  { %994 = vmatmul.mubr.bf16.gmra.mrb[4].mxu1 %v397_v47  ;;  %v650_v47 = vpop.permute.xlu1 %649 }
 0x126   :  { %997 = vmatprep.mubr.bf16.mxu1 %v398_v48 }
 0x12d   :  { %998 = vmatmul.mubr.bf16.gmra.mrb[8].mxu1 %v399_v51 }
 0x12e   :  { %1001 = vmatprep.mubr.bf16.mxu1 %v400_v52 }
 0x135   :  { %1002 = vmatmul.mubr.bf16.gmra.mrb[12].mxu1 %v401_v49 }
 0x1f0   :  { %v991_v60 = vpop.f32.mrb[0].mxu1 }
 0x1f1   :  { %v664_v62 = vmul.f32 %v991_v60, %v595_v55  ;;  %v452_v63 = vpop.f32.mrb[1].mxu1 }
 0x1f2   :  { %v662_v1 = vmul.f32 %v585_v53, %v452_v63  ;;  %v992_v2 = vpop.f32.mrb[2].mxu1 }
 0x1f3   :  { %v687_v3 = vadd.f32 %v1253_v61, %v664_v62  ;;  %v665_v4 = vmul.f32 %v992_v2, %v600_v56  ;;  %v455_v5 = vpop.f32.mrb[3].mxu1  ;;  %v660_v62 = vpop.permute.xlu1 %659 }
 0x1f4   :  { %v685_v6 = vadd.f32 %v1253_v61, %v662_v1  ;;  %v663_v7 = vmul.f32 %v590_v54, %v455_v5  ;;  %v655_v54 = vpop.permute.xlu0 %654 }
 0x1f5   :  { %v688_v8 = vadd.f32 %v1253_v61, %v665_v4  ;;  %v703_v11 = vmax.f32 %v687_v3, 0.0 }
 0x1f6   :  { %v686_v10 = vadd.f32 %v1253_v61, %v663_v7  ;;  %v701_v14 = vmax.f32 %v685_v6, 0.0 }
 0x1f7   :  { %v704_v12 = vmax.f32 %v688_v8, 0.0 }
 0x1f8   :  { %v702_v15 = vmax.f32 %v686_v10, 0.0  ;;  %v995_v16 = vpop.f32.mrb[4].mxu1 }
 0x1f9   :  { %v870_v17 = vpack.c.bf16 %v704_v12, %v703_v11  ;;  %v668_v18 = vmul.f32 %v995_v16, %v615_v59  ;;  %v468_v19 = vpop.f32.mrb[5].mxu1 }
 0x1fa   :  { %v865_v20 = vpack.c.bf16 %v702_v15, %v701_v14  ;;  %v666_v21 = vmul.f32 %v605_v57, %v468_v19  ;;  %v996_v22 = vpop.f32.mrb[6].mxu1 }
 0x1fb   :  { %902 = vst [vmem:[#allocation3 + $0x8] sm:$0xff] %v870_v17   ;;  %v691_v23 = vadd.f32 %v1253_v61, %v668_v18  ;;  %v669_v24 = vmul.f32 %v996_v22, %v620_v0  ;;  %v471_v25 = vpop.f32.mrb[7].mxu1 }
 0x1fc   :  { %866 = vst [vmem:[#allocation3] sm:$0xff] %v865_v20   ;;  %v689_v27 = vadd.f32 %v1253_v61, %v666_v21  ;;  %v667_v28 = vmul.f32 %v610_v58, %v471_v25 }
 0x1fd   :  { %v692_v29 = vadd.f32 %v1253_v61, %v669_v24  ;;  %v707_v32 = vmax.f32 %v691_v23, 0.0 }
 0x1fe   :  { %v690_v31 = vadd.f32 %v1253_v61, %v667_v28  ;;  %v705_v34 = vmax.f32 %v689_v27, 0.0 }
 0x1ff   :  { %v708_v33 = vmax.f32 %v692_v29, 0.0 }
 0x200   :  { %v706_v35 = vmax.f32 %v690_v31, 0.0  ;;  %v999_v36 = vpop.f32.mrb[8].mxu1 }
 0x201   :  { %v880_v37 = vpack.c.bf16 %v708_v33, %v707_v32  ;;  %v672_v38 = vmul.f32 %v999_v36, %v635_v26  ;;  %v484_v39 = vpop.f32.mrb[9].mxu1 }
 0x202   :  { %v875_v41 = vpack.c.bf16 %v706_v35, %v705_v34  ;;  %v670_v42 = vmul.f32 %v625_v9, %v484_v39  ;;  %v1000_v43 = vpop.f32.mrb[10].mxu1 }
 0x203   :  { %904 = vst [vmem:[#allocation3 + $0x18] sm:$0xff] %v880_v37   ;;  %v695_v44 = vadd.f32 %v1253_v61, %v672_v38  ;;  %v673_v45 = vmul.f32 %v1000_v43, %v640_v30  ;;  %v487_v46 = vpop.f32.mrb[11].mxu1 }
 0x204   :  { %903 = vst [vmem:[#allocation3 + $0x10] sm:$0xff] %v875_v41   ;;  %v693_v48 = vadd.f32 %v1253_v61, %v670_v42  ;;  %v671_v50 = vmul.f32 %v630_v13, %v487_v46 }
 0x205   :  { %v696_v51 = vadd.f32 %v1253_v61, %v673_v45  ;;  %v711_v49 = vmax.f32 %v695_v44, 0.0 }
 0x206   :  { %v694_v52 = vadd.f32 %v1253_v61, %v671_v50  ;;  %v709_v55 = vmax.f32 %v693_v48, 0.0 }
 0x207   :  { %v712_v53 = vmax.f32 %v696_v51, 0.0 }
 0x208   :  { %v710_v56 = vmax.f32 %v694_v52, 0.0  ;;  %v1003_v57 = vpop.f32.mrb[12].mxu1 }
 0x209   :  { %v890_v58 = vpack.c.bf16 %v712_v53, %v711_v49  ;;  %v676_v59 = vmul.f32 %v1003_v57, %v655_v54  ;;  %v500_v60 = vpop.f32.mrb[13].mxu1 }
 0x20a   :  { %v885_v63 = vpack.c.bf16 %v710_v56, %v709_v55  ;;  %v674_v0 = vmul.f32 %v645_v40, %v500_v60  ;;  %v1004_v1 = vpop.f32.mrb[14].mxu1 }
 0x20b   :  { %906 = vst [vmem:[#allocation3 + $0x28] sm:$0xff] %v890_v58   ;;  %v699_v2 = vadd.f32 %v1253_v61, %v676_v59  ;;  %v677_v3 = vmul.f32 %v1004_v1, %v660_v62  ;;  %v503_v4 = vpop.f32.mrb[15].mxu1 }
 0x20c   :  { %905 = vst [vmem:[#allocation3 + $0x20] sm:$0xff] %v885_v63   ;;  %v697_v5 = vadd.f32 %v1253_v61, %v674_v0  ;;  %v675_v6 = vmul.f32 %v650_v47, %v503_v4 }
 0x20d   :  { %v700_v7 = vadd.f32 %v1253_v61, %v677_v3  ;;  %v715_v9 = vmax.f32 %v699_v2, 0.0 }
 0x20e   :  { %v698_v8 = vadd.f32 %v1253_v61, %v675_v6  ;;  %v713_v11 = vmax.f32 %v697_v5, 0.0 }
 0x20f   :  { %v716_v10 = vmax.f32 %v700_v7, 0.0 }
 0x210   :  { %v714_v12 = vmax.f32 %v698_v8, 0.0 }
 0x211   :  { %v900_v13 = vpack.c.bf16 %v716_v10, %v715_v9 }
 0x212   :  { %v895_v14 = vpack.c.bf16 %v714_v12, %v713_v11 }
 0x213   :  { %908 = vst [vmem:[#allocation3 + $0x38] sm:$0xff] %v900_v13  }
 0x214   :  { %907 = vst [vmem:[#allocation3 + $0x30] sm:$0xff] %v895_v14  }
 0x215   :  { %1038 = shalt.err (!%p1035_p4)
}
 0x216   :  { %s1039_s27 = scalar_lea.hbm %s1289_s6, 1024 }
 0x217   :  { %p1040_p5 = scmp.ne.s32.totalorder %s1289_s6, %s1039_s27  ;;  %p1043_p6 = scmp.lt.u32.totalorder %s1039_s27, %s1289_s6 }
 0x219   :  { %p1045_p7 = pnand %p1043_p6, %p1040_p5 }
 0x21b   :  { %1048 = shalt.err (!%p1045_p7)
}
 0x21c   :  { %s1053_s7 = smov 64   ;;  %s1054_s8 = smov 4  }
 0x21d   :  { %808 = dma.vmem_to_hbm [thread:$0]  %s803_s5, 1024, %s1289_s6, [#allocation4], %s1053_s7, %s1053_s7, %s1054_s8  }
 0x21e   :  { %1049 = dma.done.wait [#allocation4], 1024  }
 0x21f   :  { %1050 = vsyncadd [#allocation4], 4294966272 }
 0x220   :  { %812 = vsyncpa [#allocation4], 1 }

</bundles_post_ra>
